<compile_context>
chip_gen: v7x
topology: tpu7x:2x2x1
jax: 0.10.0
libtpu: 0.0.40
codegen_flags: <defaults>
</compile_context>

<pallas_src>
import numpy as np
import jax
import jax.numpy as jnp
from jax.experimental import pallas as pl
from jax.experimental.pallas import tpu as pltpu


def _round_up(v, m):
    return ((v + m - 1) // m) * m


# ----------------------------- Pallas kernel ------------------------------- #
def _ee_kernel(x_ref, w_ref, b_ref, o_ref):
    # out_tile = x_tile @ W_full + b_full   (MXU matmul, f32 accumulation)
    acc = jnp.dot(x_ref[...], w_ref[...], preferred_element_type=jnp.float32)
    # Bias add in f32 (safe on v5e which has no bf16 VALU); single cast on store.
    o_ref[...] = (acc + b_ref[...].astype(jnp.float32)).astype(o_ref.dtype)


def _choose_block_b(B, D_in, D_out, itemsize, requested,
                    vmem_budget_bytes=40 << 20):
    """Pick the batch tile: big (fewer grid steps), VMEM-safe, 2-TC friendly."""
    # Double-buffered x and out tiles dominate VMEM (W/bias are tiny & resident).
    bytes_per_row = 2 * (D_in + D_out) * max(int(itemsize), 1)
    vmem_cap = max(8, (vmem_budget_bytes // bytes_per_row) // 8 * 8)
    # Keep the grid length >= 2 when the batch allows it so both TensorCores of
    # a v7x chip get work under dimension_semantics=("parallel",).
    two_core_cap = _round_up(max(pl.cdiv(B, 2), 8), 8)
    bb = max(8, min(int(requested), vmem_cap, two_core_cap))
    if bb >= 128:
        bb = (bb // 128) * 128   # MXU-row friendly on v5e/v6e/v7x
    return bb


def _build_call(B, D_in, D_out, dtype, bb, *, single_buffer_resident):
    # W and bias have a constant index_map (resident across the whole grid);
    # request a single pipeline buffer for them to halve their VMEM cost.
    resident_kw = (dict(pipeline_mode=pl.Buffered(1))
                   if single_buffer_resident else {})
    grid = pl.cdiv(B, bb)   # ragged last block: Pallas masks OOB stores
    return pl.pallas_call(
        _ee_kernel,
        out_shape=jax.ShapeDtypeStruct((B, D_out), dtype),
        grid_spec=pltpu.PrefetchScalarGridSpec(
            num_scalar_prefetch=0,
            grid=(grid,),
            in_specs=[
                pl.BlockSpec((bb, D_in), lambda i: (i, 0)),                   # x tile
                pl.BlockSpec((D_in, D_out), lambda i: (0, 0), **resident_kw), # full W
                pl.BlockSpec((1, D_out), lambda i: (0, 0), **resident_kw),    # bias row
            ],
            out_specs=pl.BlockSpec((bb, D_out), lambda i: (i, 0)),
        ),
        compiler_params=pltpu.CompilerParams(
            dimension_semantics=("parallel",),
            # Above the scoped default, below v7x's 64 MiB physical VMEM.
            vmem_limit_bytes=48 * 1024 * 1024,
        ),
    )


def learned_entity_embedding_forward(x, w_full, b_full, *, block_b=1024):
    """Embedding forward pass as a single batch-tiled Pallas matmul kernel."""
    B, D_in = x.shape
    D_out = w_full.shape[-1]
    w2 = w_full.astype(x.dtype)
    b2 = b_full.reshape(1, D_out).astype(x.dtype)
    bb = _choose_block_b(B, D_in, D_out, x.dtype.itemsize, block_b)
    try:
        fn = _build_call(B, D_in, D_out, x.dtype, bb, single_buffer_resident=True)
        return fn(x, w2, b2)
    except Exception:
        # Older/stricter JAX builds may reject Buffered(1) on a top-level
        # pallas_call operand; fall back to default double-buffering.
        fn = _build_call(B, D_in, D_out, x.dtype, bb, single_buffer_resident=False)
        return fn(x, w2, b2)


# --------------------------- parameter assembly ----------------------------- #
def build_params(config, num_input_features, num_numerical_features, key):
    """Replicates _LearnedEntityEmbedding.__init__ logic and builds W_full/b_full."""
    num_input_features = np.asarray(num_input_features)
    categorical = num_input_features > 0
    num_categorical_features = num_input_features[categorical]

    embed_features = [int(n) >= config['min_unique_values_for_embedding']
                      for n in num_input_features]

    num_output_dimensions = [0] * num_numerical_features
    num_output_dimensions.extend(
        [config['dimension_reduction_' + str(i)] * int(n)
         for i, n in enumerate(num_categorical_features)])
    num_output_dimensions = [int(np.clip(o, 1, int(n) - 1))
                             for o, n in zip(num_output_dimensions, num_input_features)]
    num_output_dimensions = [o if e else int(n)
                             for o, e, n in zip(num_output_dimensions, embed_features,
                                                num_input_features)]

    # per-feature column widths in x / out (per forward() semantics)
    in_widths = [int(n) if e else 1 for n, e in zip(num_input_features, embed_features)]
    out_widths = [int(o) if e else 1 for o, e in zip(num_output_dimensions, embed_features)]
    D_in, D_out = sum(in_widths), sum(out_widths)

    # deterministic nn.Linear-style init: U(-1/sqrt(fan_in), 1/sqrt(fan_in))
    layers = []
    for n, e, o in zip(num_input_features, embed_features, num_output_dimensions):
        if not e:
            continue
        key, kw, kb = jax.random.split(key, 3)
        bound = 1.0 / np.sqrt(float(n))
        W = jax.random.uniform(kw, (int(o), int(n)), jnp.float32, -bound, bound)
        b = jax.random.uniform(kb, (int(o),), jnp.float32, -bound, bound)
        layers.append((W, b))

    # assemble the block-structured mapping matrix for the single-matmul kernel
    w_full = np.zeros((D_in, D_out), np.float32)
    b_full = np.zeros((1, D_out), np.float32)
    in_p = out_p = lp = 0
    for e, iw, ow in zip(embed_features, in_widths, out_widths):
        if e:
            W, b = layers[lp]
            w_full[in_p:in_p + iw, out_p:out_p + ow] = np.asarray(W).T
            b_full[0, out_p:out_p + ow] = np.asarray(b)
            lp += 1
        else:
            w_full[in_p, out_p] = 1.0  # pass-through column
        in_p += iw
        out_p += ow

    return dict(w_full=jnp.asarray(w_full), b_full=jnp.asarray(b_full),
                layers=layers, embed_features=embed_features,
                num_output_dimensions=num_output_dimensions,
                D_in=D_in, D_out=D_out)


# --------------------- pure-JAX reference (literal port) -------------------- #
def reference_forward(x, num_input_features, embed_features, layers):
    concat_seq = []
    last_concat = 0
    x_pointer = 0
    layer_pointer = 0
    for num_in, embed in zip(num_input_features, embed_features):
        if not embed:
            x_pointer += 1
            continue
        if x_pointer > last_concat:
            concat_seq.append(x[:, last_concat:x_pointer])
        sl = x[:, x_pointer:x_pointer + int(num_in)]
        W, b = layers[layer_pointer]
        concat_seq.append(sl @ W.T + b)
        layer_pointer += 1
        x_pointer += int(num_in)
        last_concat = x_pointer
    concat_seq.append(x[:, last_concat:])
    return jnp.concatenate(concat_seq, axis=1)


# ---------------------------------- main ------------------------------------ #
if __name__ == "__main__":
    # 3 numerical features + 3 categorical features with 7 / 5 / 12 categories
    config = {
        'min_unique_values_for_embedding': 4,
        'dimension_reduction_0': 0.5,
        'dimension_reduction_1': 0.6,
        'dimension_reduction_2': 0.25,
    }
    num_numerical = 3
    num_input_features = np.array([0, 0, 0, 7, 5, 12])

    key = jax.random.PRNGKey(0)
    key, kp, kx_num, kx_cat = jax.random.split(key, 4)
    params = build_params(config, num_input_features, num_numerical, kp)

    # Batch deliberately NOT a multiple of the tile: exercises the no-pad,
    # ragged-last-block (masked store) path.
    B = 50
    x_num = jax.random.normal(kx_num, (B, num_numerical), jnp.float32)
    parts = [x_num]
    for n, kk in zip([7, 5, 12], jax.random.split(kx_cat, 3)):
        idx = jax.random.randint(kk, (B,), 0, n)
        parts.append(jax.nn.one_hot(idx, n, dtype=jnp.float32))
    x = jnp.concatenate(parts, axis=1)
    assert x.shape == (B, params['D_in'])

    ref = reference_forward(x, num_input_features, params['embed_features'],
                            params['layers'])

    # f32 path (exact vs. reference)
    out = learned_entity_embedding_forward(x, params['w_full'], params['b_full'])
    out = jax.block_until_ready(out)
    assert out.shape == (B, params['D_out'])
    np.testing.assert_allclose(np.asarray(out), np.asarray(ref),
                               rtol=1e-5, atol=1e-5)

    # bf16 path (halves HBM traffic on v6e/v7x; MXU accumulation stays f32)
    out_bf16 = learned_entity_embedding_forward(
        x.astype(jnp.bfloat16), params['w_full'], params['b_full'])
    out_bf16 = jax.block_until_ready(out_bf16)
    assert out_bf16.shape == (B, params['D_out'])
    np.testing.assert_allclose(np.asarray(out_bf16.astype(jnp.float32)),
                               np.asarray(ref), rtol=2e-2, atol=2e-2)

    print("KERNEL_OK")
</pallas_src>

<mosaic_0001>
module attributes {stable_mosaic.version = 11 : i64} {
  func.func @_ee_kernel(%arg0: i32, %arg1: memref<32x27xf32, #tpu.memory_space<vmem>>, %arg2: memref<27x12xf32, #tpu.memory_space<vmem>>, %arg3: memref<1x12xf32, #tpu.memory_space<vmem>>, %arg4: memref<32x12xf32, #tpu.memory_space<vmem>>) attributes {dimension_semantics = [#tpu.dimension_semantics<parallel>], iteration_bounds = array<i64: 2>, scalar_prefetch = 0 : i64, scratch_operands = 0 : i64, tpu.core_type = #tpu.core_type<tc>, window_params = [{transform_indices = @transform_0, window_bounds = array<i64: 32, 27>}, {pipeline_mode = #tpu.pipeline_mode<synchronous>, transform_indices = @transform_1, window_bounds = array<i64: 27, 12>}, {pipeline_mode = #tpu.pipeline_mode<synchronous>, transform_indices = @transform_2, window_bounds = array<i64: 1, 12>}, {transform_indices = @transform_3, window_bounds = array<i64: 32, 12>}]} {
    %c0 = arith.constant 0 : index
    %c0_0 = arith.constant 0 : index
    %0 = vector.load %arg1[%c0, %c0_0] : memref<32x27xf32, #tpu.memory_space<vmem>>, vector<32x27xf32>
    %c0_1 = arith.constant 0 : index
    %c0_2 = arith.constant 0 : index
    %1 = vector.load %arg2[%c0_1, %c0_2] : memref<27x12xf32, #tpu.memory_space<vmem>>, vector<27x12xf32>
    %cst = arith.constant dense<0.000000e+00> : vector<32x12xf32>
    %2 = tpu.matmul %0, %1, %cst {dimension_numbers = #tpu.dot_dimension_numbers<[1], [0], [0], [1], [0, 0, 1, 1], [], []>} : vector<32x27xf32>, vector<27x12xf32>, vector<32x12xf32> -> vector<32x12xf32>
    %c0_3 = arith.constant 0 : index
    %c0_4 = arith.constant 0 : index
    %3 = vector.load %arg3[%c0_3, %c0_4] : memref<1x12xf32, #tpu.memory_space<vmem>>, vector<1x12xf32>
    %4 = vector.broadcast %3 : vector<1x12xf32> to vector<32x12xf32>
    %5 = arith.addf %2, %4 : vector<32x12xf32>
    %c0_5 = arith.constant 0 : index
    %c0_6 = arith.constant 0 : index
    %6 = vector.load %arg4[%c0_5, %c0_6] : memref<32x12xf32, #tpu.memory_space<vmem>>, vector<32x12xf32>
    tpu.vector_store %arg4[%c0_5, %c0_6], %5 {strides = array<i32>} : memref<32x12xf32, #tpu.memory_space<vmem>>, vector<32x12xf32>,
    return
  }
  func.func @transform_0(%arg0: i32) -> (i32, i32) {
    %c0_i32 = arith.constant 0 : i32
    %c0_i32_0 = arith.constant 0 : i32
    return %arg0, %c0_i32 : i32, i32
  }
  func.func @transform_1(%arg0: i32) -> (i32, i32) {
    %c0_i32 = arith.constant 0 : i32
    %c0_i32_0 = arith.constant 0 : i32
    %c0_i32_1 = arith.constant 0 : i32
    return %c0_i32, %c0_i32_0 : i32, i32
  }
  func.func @transform_2(%arg0: i32) -> (i32, i32) {
    %c0_i32 = arith.constant 0 : i32
    %c0_i32_0 = arith.constant 0 : i32
    %c0_i32_1 = arith.constant 0 : i32
    return %c0_i32, %c0_i32_0 : i32, i32
  }
  func.func @transform_3(%arg0: i32) -> (i32, i32) {
    %c0_i32 = arith.constant 0 : i32
    %c0_i32_0 = arith.constant 0 : i32
    return %arg0, %c0_i32 : i32, i32
  }
}

module attributes {stable_mosaic.version = 11 : i64} {
  func.func @_ee_kernel(%arg0: i32, %arg1: memref<32x27xf32, #tpu.memory_space<vmem>>, %arg2: memref<27x12xf32, #tpu.memory_space<vmem>>, %arg3: memref<1x12xf32, #tpu.memory_space<vmem>>, %arg4: memref<32x12xf32, #tpu.memory_space<vmem>>) attributes {dimension_semantics = [#tpu.dimension_semantics<parallel>], iteration_bounds = array<i64: 2>, scalar_prefetch = 0 : i64, scratch_operands = 0 : i64, tpu.core_type = #tpu.core_type<tc>, window_params = [{transform_indices = @transform_0, window_bounds = array<i64: 32, 27>}, {pipeline_mode = #tpu.pipeline_mode<synchronous>, transform_indices = @transform_1, window_bounds = array<i64: 27, 12>}, {pipeline_mode = #tpu.pipeline_mode<synchronous>, transform_indices = @transform_2, window_bounds = array<i64: 1, 12>}, {transform_indices = @transform_3, window_bounds = array<i64: 32, 12>}]} {
    %c0 = arith.constant 0 : index
    %c0_0 = arith.constant 0 : index
    %0 = vector.load %arg1[%c0, %c0_0] : memref<32x27xf32, #tpu.memory_space<vmem>>, vector<32x27xf32>
    %c0_1 = arith.constant 0 : index
    %c0_2 = arith.constant 0 : index
    %1 = vector.load %arg2[%c0_1, %c0_2] : memref<27x12xf32, #tpu.memory_space<vmem>>, vector<27x12xf32>
    %cst = arith.constant dense<0.000000e+00> : vector<32x12xf32>
    %2 = tpu.matmul %0, %1, %cst {dimension_numbers = #tpu.dot_dimension_numbers<[1], [0], [0], [1], [0, 0, 1, 1], [], []>} : vector<32x27xf32>, vector<27x12xf32>, vector<32x12xf32> -> vector<32x12xf32>
    %c0_3 = arith.constant 0 : index
    %c0_4 = arith.constant 0 : index
    %3 = vector.load %arg3[%c0_3, %c0_4] : memref<1x12xf32, #tpu.memory_space<vmem>>, vector<1x12xf32>
    %4 = vector.broadcast %3 : vector<1x12xf32> to vector<32x12xf32>
    %5 = arith.addf %2, %4 : vector<32x12xf32>
    %c0_5 = arith.constant 0 : index
    %c0_6 = arith.constant 0 : index
    %6 = vector.load %arg4[%c0_5, %c0_6] : memref<32x12xf32, #tpu.memory_space<vmem>>, vector<32x12xf32>
    tpu.vector_store %arg4[%c0_5, %c0_6], %5 {strides = array<i32>} : memref<32x12xf32, #tpu.memory_space<vmem>>, vector<32x12xf32>,
    return
  }
  func.func @transform_0(%arg0: i32) -> (i32, i32) {
    %c0_i32 = arith.constant 0 : i32
    %c0_i32_0 = arith.constant 0 : i32
    return %arg0, %c0_i32 : i32, i32
  }
  func.func @transform_1(%arg0: i32) -> (i32, i32) {
    %c0_i32 = arith.constant 0 : i32
    %c0_i32_0 = arith.constant 0 : i32
    %c0_i32_1 = arith.constant 0 : i32
    return %c0_i32, %c0_i32_0 : i32, i32
  }
  func.func @transform_2(%arg0: i32) -> (i32, i32) {
    %c0_i32 = arith.constant 0 : i32
    %c0_i32_0 = arith.constant 0 : i32
    %c0_i32_1 = arith.constant 0 : i32
    return %c0_i32, %c0_i32_0 : i32, i32
  }
  func.func @transform_3(%arg0: i32) -> (i32, i32) {
    %c0_i32 = arith.constant 0 : i32
    %c0_i32_0 = arith.constant 0 : i32
    return %arg0, %c0_i32 : i32, i32
  }
}

</mosaic_0001>

<bundles_post_ra>
// kernel: tpu_custom_call.1
= control target key start
LH: loop header
LB: loop body
LE: loop exit
PB: predicated region body
PF: predicated region fallthrough
CT: control target
= control target key end

     0   :  { %s808_s12 = smov 0   ;;  %s810_s13 = smov 0   ;;  %s923_s0 = inlined_call_operand.vmem [shape: f32[50,27], index: 0, kind: input, shape index: {}]   ;;  %s924_s1 = inlined_call_operand.vmem [shape: f32[27,12], index: 1, kind: input, shape index: {}]   ;;  %s925_s2 = inlined_call_operand.vmem [shape: f32[1,12], index: 2, kind: input, shape index: {}]   ;;  %s926_s3 = inlined_call_operand.vmem [shape: f32[50,12], index: 3, kind: output, shape index: {}]  }
   0x1   :  { %s812_s14 = smov 0  }
   0x2 LB: > { %s821_s15 = sadd.s32 4294967295, %s753_s14   ;;  %s823_s16 = sadd.s32 1, %s753_s14   ;;  %s753_s14 = sphi %s812_s14, %s933_s14   ;;  %s749_s13 = sphi %s810_s13, %s932_s13   ;;  %s745_s12 = sphi %s808_s12, %s931_s12  }
   0x3   : > { %s85_s17 = ssub.s32 %s753_s14, %s823_s16  ;;  %s88_s18 = sadd.s32 1, %s749_s13 }
   0x4   : > { %p86_p0 = scmp.eq.s32.totalorder %s85_s17, 0  ;;  %p98_p1 = scmp.ne.s32.totalorder %s749_s13, %s745_s12 }
   0x5   : > { %p99_p2 = scmp.eq.s32.totalorder %s821_s15, 1  ;;  %p544_p3 = scmp.ge.s32.totalorder %s753_s14, 1 }
   0x6   : > { %s831_s19 = scalar_select %p86_p0, %s749_s13, %s88_s18  }
   0x7   : > { %p833_p4 = por %p99_p2, %p98_p1  ;;  %p146_p5 = scmp.lt.s32.totalorder %s753_s14, 3 }
   0x9   : > { %p147_p6 = pnand %p544_p3, %p146_p5 }
   0xa   : > { %v196_v0 = vld [vmem:[%s924_s1] sm:$0xff] (!%p147_p6)  ;;  %v197_v1 = vld [vmem:[%s924_s1 + $0x8] sm:$0xff] (!%p147_p6)  ;;  %v198_v2 = vld [vmem:[%s924_s1 + $0x10] sm:$0xff] (!%p147_p6)  ;;  %vm220_vm0 = vcmask (!%p147_p6), 1042432   ;;  %s847_s27 = sshll.u32 (!%p147_p6), %s821_s15, 2  ;;  %vm787_vm1 = vmmov (!%p147_p6), 1  }
   0xb   : > { %150 = sbr.rel (%p147_p6) target bundleno = 289 (0x121), region = 32  ;;  %v596_v3 = vpack.c.bf16 (!%p147_p6), %v197_v1, %v196_v0  ;;  %v199_v4 = vld [vmem:[%s924_s1 + $0x18] sm:$0x7] (!%p147_p6)  ;;  %p178_p7 = scmp.lt.s32.totalorder (!%p147_p6), %s847_s27, 6  ;;  %vm601_vm2 = vmpackc.low (!%p147_p6), %vm220_vm0, %vm787_vm1  ;;  %vm207_vm3 = vcmask (!%p147_p6), 220160   ;;  %vm309_vm4 = vcmask (!%p147_p6), 97280  }
   0xc   : > { %v600_v5 = vpack.c.bf16 (!%p147_p6), %v199_v4, %v198_v2  ;;  %s170_s8 = sand.u32 (!%p147_p6), 1, %s745_s12   ;;  %v548_v10 = vld [vmem:[%s925_s2] ss:$0 sm:$0xff] (!%p147_p6) }
   0xd   : > { %597 = vmatprep.subr.bf16.mxu0 (!%p147_p6), %v596_v3  ;;  %606 = vmatprep.subr.bf16.mxu1 (!%p147_p6), %v596_v3  ;;  %s545_s9 = sshll.u32 (!%p147_p6), %s170_s8, 5 }
   0xe   : > { %599 = vmatpush3.bf16.msra.mxu0 (!%p147_p6), %v596_v3  ;;  %608 = vmatpush3.bf16.msra.mxu1 (!%p147_p6), %v596_v3  ;;  %s861_s14 = scalar_lea.vmem (!%p147_p6), [#allocation2], %s545_s9  }
   0xf   : > { %602 = vmatprep.subr.msk.bf16.mxu0 (!%p147_p6), %vm601_vm2, %v600_v5  ;;  %607 = vmatprep.subr.msk.bf16.mxu1 (!%p147_p6), %vm601_vm2, %v600_v5 }
  0x12   : > { %s179_s30 = scalar_select %p178_p7, %s847_s27, 6  ;;  %605 = vmatpush3.bf16.msk.msra.mxu0 %vm601_vm2, %v600_v5  ;;  %609 = vmatpush3.bf16.msk.msra.mxu1 %vm601_vm2, %v600_v5 }
  0x13   : > { %s322_s12 = ssub.s32 (%p833_p4), 7, %s847_s27  ;;  %s571_s17 = sshll.u32 (%p833_p4), %s821_s15, 5 }
  0x14   : > { %s547_s4 = sshll.u32 %s179_s30, 3  ;;  %p323_p8 = scmp.lt.s32.totalorder (%p833_p4), %s322_s12, 4 }
  0x15   : > { %s181_s7 = scalar_lea.vmem %s923_s0, %s547_s4  ;;  %s874_s22 = scalar_lea.vmem (%p833_p4), %s926_s3, %s571_s17  }
  0x16   : > { %v192_v6 = vld [vmem:[%s181_s7] sm:$0xff]  ;;  %v194_v7 = vld [vmem:[%s181_s7 + $0x10] sm:$0xff]  ;;  %v193_v8 = vld [vmem:[%s181_s7 + $0x8] sm:$0xff] }
  0x17   : > { %v195_v9 = vld [vmem:[%s181_s7 + $0x18] sm:$0xff]  ;;  %590 = vmatprep.mubr.msk.f32.mxu0 %vm207_vm3, %v192_v6  ;;  %593 = vmatprep.mubr.msk.f32.mxu1 %vm207_vm3, %v194_v7 }
  0x18   : > { %591 = vmatmul.mubr.msk.f32.vlgmr.msra.gmra.mrb[0].mxu0 %vm207_vm3, %v193_v8  ;;  %594 = vmatmul.mubr.msk.f32.vlgmr.msra.gmra.mrb[0].mxu1 %vm207_vm3, %v195_v9 }
  0xe9   : > { %320 = sbr.rel (!%p833_p4) target bundleno = 289 (0x121), region = 36 }
  0xeb   : > { %v592_v11 = vpop.f32.mrb[0].mxu0  ;;  %v595_v12 = vpop.f32.mrb[0].mxu1 }
  0xec   : > { %v296_v13 = vadd.f32 %v592_v11, %v548_v10  ;;  %v306_v14 = vadd.f32 %v595_v12, %v548_v10  ;;  %v290_v15 = vpop.f32.mrb[1].mxu0  ;;  %v300_v16 = vpop.f32.mrb[1].mxu1 }
  0xed   : > { %v291_v17 = vadd.f32 %v548_v10, %v290_v15  ;;  %v301_v18 = vadd.f32 %v548_v10, %v300_v16 }
  0xee   : > { %311 = vst.msk [vmem:[%s861_s14 + $0x8] sm:$0xff] %vm309_vm4, %v296_v13  ;;  %313 = vst.msk [vmem:[%s861_s14 + $0x18] sm:$0xff] %vm309_vm4, %v306_v14 }
  0xef   : > { %310 = vst.msk [vmem:[%s861_s14] sm:$0xff] %vm309_vm4, %v291_v17  ;;  %312 = vst.msk [vmem:[%s861_s14 + $0x10] sm:$0xff] %vm309_vm4, %v301_v18 }
  0xf0   : > { %s935_s12 = smov (!%p323_p8, %s322_s12), 4 }
  0xf1   : > { %s556_s23 = sshll.u32 %s935_s12, 7 }
  0xf2   : > { %p559_p9 = scmp.eq.s32.totalorder %s556_s23, 0 }
  0xf3   : > { %s880_s24 = sshrl.u32 (!%p559_p9), %s935_s12, 2 }
  0xf4   : > { %331 = sbr.rel (%p559_p9) target bundleno = 289 (0x121), region = 40  ;;  %p560_p10 = scmp.le.s32.totalorder (!%p559_p9), %s880_s24, 0 }
  0xfb   : > { %497 = sbr.rel (%p560_p10) target bundleno = 268 (0x10c), region = 116  ;;  %s928_s15 = smov (!%p560_p10), %s874_s22 }
  0xfc   : > { %s929_s20 = smov (!%p560_p10), %s861_s14  ;;  %s889_s25 = smov (!%p560_p10), 0  }
  0xfd   : > { %s767_s26 = smov (!%p560_p10), 0  }
 0x102 LB: >> { %v399_v19 = vld [vmem:[%s761_s20] sm:$0xff]  ;;  %v401_v20 = vld [vmem:[%s761_s20 + $0x8] sm:$0xff]  ;;  %v403_v21 = vld [vmem:[%s761_s20 + $0x10] sm:$0xff]  ;;  %s407_s27 = sadd.s32 1, %s765_s25  ;;  %s393_s26 = sadd.s32 1, %s769_s26   ;;  %s769_s26 = sphi %s767_s26, %s393_s26   ;;  %s765_s25 = sphi %s889_s25, %s930_s25   ;;  %s761_s20 = sphi %s929_s20, %s412_s20   ;;  %s757_s15 = sphi %s928_s15, %s413_s15  }
 0x103   : >> { %400 = vst [vmem:[%s757_s15] sm:$0xff] %v399_v19  ;;  %402 = vst [vmem:[%s757_s15 + $0x8] sm:$0xff] %v401_v20  ;;  %v405_v22 = vld [vmem:[%s761_s20 + $0x18] sm:$0xff]  ;;  %p408_p11 = scmp.ge.s32.totalorder %s407_s27, %s880_s24  ;;  %p392_p12 = scmp.ge.s32.totalorder %s393_s26, %s880_s24 }
 0x104   : >> { %404 = vst [vmem:[%s757_s15 + $0x10] sm:$0xff] %v403_v21  ;;  %406 = vst [vmem:[%s757_s15 + $0x18] sm:$0xff] %v405_v22 }
 0x105   : >> { %s937_s27 = smov (%p408_p11, %s407_s27), 0  ;;  %395 = sbr.rel (!%p392_p12) target bundleno = 258 (0x102), region = 122 }
 0x106   : >> { %s561_s28 = sshll.u32 %s937_s27, 5  ;;  %s930_s25 = smov %s937_s27 }
 0x107   : >> { %s412_s20 = scalar_lea.vmem %s861_s14, %s561_s28 [#allocation2]   ;;  %s413_s15 = scalar_lea.vmem %s874_s22, %s561_s28  }
 0x10c PF: > { %s905_s29 = sand.u32 3, %s935_s12   ;;  %s572_s30 = sshll.u32 %s880_s24, 5 }
 0x10d   : > { %s418_s4 = scalar_lea.vmem %s861_s14, %s572_s30 [#allocation2]   ;;  %s420_s5 = scalar_lea.vmem %s874_s22, %s572_s30  }
 0x10e   : > { %p566_p13 = scmp.le.s32.totalorder %s905_s29, 0 }
 0x10f   : > { %s771_s6 = smov (!%p566_p13), %s420_s5   ;;  %s775_s7 = smov (!%p566_p13), %s418_s4  }
 0x110   : > { %511 = sbr.rel (%p566_p13) target bundleno = 289 (0x121), region = 127  ;;  %s779_s8 = smov (!%p566_p13), 0  }
 0x111   : > { %s783_s9 = smov (!%p566_p13), 0  }
 0x117 LB: >> { %v430_v23 = vld [vmem:[%s777_s7] sm:$0xff]  ;;  %s432_s10 = sadd.s32 1, %s781_s8  ;;  %s424_s9 = sadd.s32 1, %s785_s9   ;;  %s785_s9 = sphi %s783_s9, %s424_s9   ;;  %s781_s8 = sphi %s779_s8, %s780_s8   ;;  %s777_s7 = sphi %s775_s7, %s437_s7   ;;  %s773_s6 = sphi %s771_s6, %s438_s6  }
 0x118   : >> { %431 = vst [vmem:[%s773_s6] sm:$0xff] %v430_v23  ;;  %p433_p0 = scmp.ge.s32.totalorder %s432_s10, %s905_s29  ;;  %p423_p1 = scmp.ge.s32.totalorder %s424_s9, %s905_s29 }
 0x11a   : >> { %s939_s10 = smov (%p433_p0, %s432_s10), 0  ;;  %426 = sbr.rel (!%p423_p1) target bundleno = 279 (0x117), region = 133 }
 0x11b   : >> { %s567_s11 = sshll.u32 %s939_s10, 3  ;;  %s780_s8 = smov %s939_s10  }
 0x11c   : >> { %s437_s7 = scalar_lea.vmem %s418_s4, %s567_s11 [#allocation2]   ;;  %s438_s6 = scalar_lea.vmem %s420_s5, %s567_s11  }
 0x121 PF: > { %p10_p2 = scmp.ge.s32.totalorder %s823_s16, 4   ;;  %s931_s12 = smov %s749_s13 }
 0x122   : > { %s932_s13 = smov %s831_s19  ;;  %s933_s14 = smov %s823_s16 }
 0x123   :  { %12 = sbr.rel (!%p10_p2) target bundleno = 2 (0x2), region = 144 }

// kernel: tpu_custom_call.1
= control target key start
LH: loop header
LB: loop body
LE: loop exit
PB: predicated region body
PF: predicated region fallthrough
CT: control target
= control target key end

     0   :  { %s808_s12 = smov 0   ;;  %s810_s13 = smov 0   ;;  %s923_s0 = inlined_call_operand.vmem [shape: f32[50,27], index: 0, kind: input, shape index: {}]   ;;  %s924_s1 = inlined_call_operand.vmem [shape: f32[27,12], index: 1, kind: input, shape index: {}]   ;;  %s925_s2 = inlined_call_operand.vmem [shape: f32[1,12], index: 2, kind: input, shape index: {}]   ;;  %s926_s3 = inlined_call_operand.vmem [shape: f32[50,12], index: 3, kind: output, shape index: {}]  }
   0x1   :  { %s812_s14 = smov 0  }
   0x2 LB: > { %s821_s15 = sadd.s32 4294967295, %s753_s14   ;;  %s823_s16 = sadd.s32 1, %s753_s14   ;;  %s753_s14 = sphi %s812_s14, %s933_s14   ;;  %s749_s13 = sphi %s810_s13, %s932_s13   ;;  %s745_s12 = sphi %s808_s12, %s931_s12  }
   0x3   : > { %s85_s17 = ssub.s32 %s753_s14, %s823_s16  ;;  %s88_s18 = sadd.s32 1, %s749_s13 }
   0x4   : > { %p86_p0 = scmp.eq.s32.totalorder %s85_s17, 0  ;;  %p98_p1 = scmp.ne.s32.totalorder %s749_s13, %s745_s12 }
   0x5   : > { %p99_p2 = scmp.eq.s32.totalorder %s821_s15, 1  ;;  %p544_p3 = scmp.ge.s32.totalorder %s753_s14, 1 }
   0x6   : > { %s831_s19 = scalar_select %p86_p0, %s749_s13, %s88_s18  }
   0x7   : > { %p833_p4 = por %p99_p2, %p98_p1  ;;  %p146_p5 = scmp.lt.s32.totalorder %s753_s14, 3 }
   0x9   : > { %p147_p6 = pnand %p544_p3, %p146_p5 }
   0xa   : > { %v196_v0 = vld [vmem:[%s924_s1] sm:$0xff] (!%p147_p6)  ;;  %v197_v1 = vld [vmem:[%s924_s1 + $0x8] sm:$0xff] (!%p147_p6)  ;;  %v198_v2 = vld [vmem:[%s924_s1 + $0x10] sm:$0xff] (!%p147_p6)  ;;  %vm220_vm0 = vcmask (!%p147_p6), 1042432   ;;  %s847_s27 = sshll.u32 (!%p147_p6), %s821_s15, 2  ;;  %vm787_vm1 = vmmov (!%p147_p6), 1  }
   0xb   : > { %150 = sbr.rel (%p147_p6) target bundleno = 289 (0x121), region = 32  ;;  %v596_v3 = vpack.c.bf16 (!%p147_p6), %v197_v1, %v196_v0  ;;  %v199_v4 = vld [vmem:[%s924_s1 + $0x18] sm:$0x7] (!%p147_p6)  ;;  %p178_p7 = scmp.lt.s32.totalorder (!%p147_p6), %s847_s27, 6  ;;  %vm601_vm2 = vmpackc.low (!%p147_p6), %vm220_vm0, %vm787_vm1  ;;  %vm207_vm3 = vcmask (!%p147_p6), 220160   ;;  %vm309_vm4 = vcmask (!%p147_p6), 97280  }
   0xc   : > { %v600_v5 = vpack.c.bf16 (!%p147_p6), %v199_v4, %v198_v2  ;;  %s170_s8 = sand.u32 (!%p147_p6), 1, %s745_s12   ;;  %v548_v10 = vld [vmem:[%s925_s2] ss:$0 sm:$0xff] (!%p147_p6) }
   0xd   : > { %597 = vmatprep.subr.bf16.mxu0 (!%p147_p6), %v596_v3  ;;  %606 = vmatprep.subr.bf16.mxu1 (!%p147_p6), %v596_v3  ;;  %s545_s9 = sshll.u32 (!%p147_p6), %s170_s8, 5 }
   0xe   : > { %599 = vmatpush3.bf16.msra.mxu0 (!%p147_p6), %v596_v3  ;;  %608 = vmatpush3.bf16.msra.mxu1 (!%p147_p6), %v596_v3  ;;  %s861_s14 = scalar_lea.vmem (!%p147_p6), [#allocation2], %s545_s9  }
   0xf   : > { %602 = vmatprep.subr.msk.bf16.mxu0 (!%p147_p6), %vm601_vm2, %v600_v5  ;;  %607 = vmatprep.subr.msk.bf16.mxu1 (!%p147_p6), %vm601_vm2, %v600_v5 }
  0x12   : > { %s179_s30 = scalar_select %p178_p7, %s847_s27, 6  ;;  %605 = vmatpush3.bf16.msk.msra.mxu0 %vm601_vm2, %v600_v5  ;;  %609 = vmatpush3.bf16.msk.msra.mxu1 %vm601_vm2, %v600_v5 }
  0x13   : > { %s322_s12 = ssub.s32 (%p833_p4), 7, %s847_s27  ;;  %s571_s17 = sshll.u32 (%p833_p4), %s821_s15, 5 }
  0x14   : > { %s547_s4 = sshll.u32 %s179_s30, 3  ;;  %p323_p8 = scmp.lt.s32.totalorder (%p833_p4), %s322_s12, 4 }
  0x15   : > { %s181_s7 = scalar_lea.vmem %s923_s0, %s547_s4  ;;  %s874_s22 = scalar_lea.vmem (%p833_p4), %s926_s3, %s571_s17  }
  0x16   : > { %v192_v6 = vld [vmem:[%s181_s7] sm:$0xff]  ;;  %v194_v7 = vld [vmem:[%s181_s7 + $0x10] sm:$0xff]  ;;  %v193_v8 = vld [vmem:[%s181_s7 + $0x8] sm:$0xff] }
  0x17   : > { %v195_v9 = vld [vmem:[%s181_s7 + $0x18] sm:$0xff]  ;;  %590 = vmatprep.mubr.msk.f32.mxu0 %vm207_vm3, %v192_v6  ;;  %593 = vmatprep.mubr.msk.f32.mxu1 %vm207_vm3, %v194_v7 }
  0x18   : > { %591 = vmatmul.mubr.msk.f32.vlgmr.msra.gmra.mrb[0].mxu0 %vm207_vm3, %v193_v8  ;;  %594 = vmatmul.mubr.msk.f32.vlgmr.msra.gmra.mrb[0].mxu1 %vm207_vm3, %v195_v9 }
  0xe9   : > { %320 = sbr.rel (!%p833_p4) target bundleno = 289 (0x121), region = 36 }
  0xeb   : > { %v592_v11 = vpop.f32.mrb[0].mxu0  ;;  %v595_v12 = vpop.f32.mrb[0].mxu1 }
  0xec   : > { %v296_v13 = vadd.f32 %v592_v11, %v548_v10  ;;  %v306_v14 = vadd.f32 %v595_v12, %v548_v10  ;;  %v290_v15 = vpop.f32.mrb[1].mxu0  ;;  %v300_v16 = vpop.f32.mrb[1].mxu1 }
  0xed   : > { %v291_v17 = vadd.f32 %v548_v10, %v290_v15  ;;  %v301_v18 = vadd.f32 %v548_v10, %v300_v16 }
  0xee   : > { %311 = vst.msk [vmem:[%s861_s14 + $0x8] sm:$0xff] %vm309_vm4, %v296_v13  ;;  %313 = vst.msk [vmem:[%s861_s14 + $0x18] sm:$0xff] %vm309_vm4, %v306_v14 }
  0xef   : > { %310 = vst.msk [vmem:[%s861_s14] sm:$0xff] %vm309_vm4, %v291_v17  ;;  %312 = vst.msk [vmem:[%s861_s14 + $0x10] sm:$0xff] %vm309_vm4, %v301_v18 }
  0xf0   : > { %s935_s12 = smov (!%p323_p8, %s322_s12), 4 }
  0xf1   : > { %s556_s23 = sshll.u32 %s935_s12, 7 }
  0xf2   : > { %p559_p9 = scmp.eq.s32.totalorder %s556_s23, 0 }
  0xf3   : > { %s880_s24 = sshrl.u32 (!%p559_p9), %s935_s12, 2 }
  0xf4   : > { %331 = sbr.rel (%p559_p9) target bundleno = 289 (0x121), region = 40  ;;  %p560_p10 = scmp.le.s32.totalorder (!%p559_p9), %s880_s24, 0 }
  0xfb   : > { %497 = sbr.rel (%p560_p10) target bundleno = 268 (0x10c), region = 116  ;;  %s928_s15 = smov (!%p560_p10), %s874_s22 }
  0xfc   : > { %s929_s20 = smov (!%p560_p10), %s861_s14  ;;  %s889_s25 = smov (!%p560_p10), 0  }
  0xfd   : > { %s767_s26 = smov (!%p560_p10), 0  }
 0x102 LB: >> { %v399_v19 = vld [vmem:[%s761_s20] sm:$0xff]  ;;  %v401_v20 = vld [vmem:[%s761_s20 + $0x8] sm:$0xff]  ;;  %v403_v21 = vld [vmem:[%s761_s20 + $0x10] sm:$0xff]  ;;  %s407_s27 = sadd.s32 1, %s765_s25  ;;  %s393_s26 = sadd.s32 1, %s769_s26   ;;  %s769_s26 = sphi %s767_s26, %s393_s26   ;;  %s765_s25 = sphi %s889_s25, %s930_s25   ;;  %s761_s20 = sphi %s929_s20, %s412_s20   ;;  %s757_s15 = sphi %s928_s15, %s413_s15  }
 0x103   : >> { %400 = vst [vmem:[%s757_s15] sm:$0xff] %v399_v19  ;;  %402 = vst [vmem:[%s757_s15 + $0x8] sm:$0xff] %v401_v20  ;;  %v405_v22 = vld [vmem:[%s761_s20 + $0x18] sm:$0xff]  ;;  %p408_p11 = scmp.ge.s32.totalorder %s407_s27, %s880_s24  ;;  %p392_p12 = scmp.ge.s32.totalorder %s393_s26, %s880_s24 }
 0x104   : >> { %404 = vst [vmem:[%s757_s15 + $0x10] sm:$0xff] %v403_v21  ;;  %406 = vst [vmem:[%s757_s15 + $0x18] sm:$0xff] %v405_v22 }
 0x105   : >> { %s937_s27 = smov (%p408_p11, %s407_s27), 0  ;;  %395 = sbr.rel (!%p392_p12) target bundleno = 258 (0x102), region = 122 }
 0x106   : >> { %s561_s28 = sshll.u32 %s937_s27, 5  ;;  %s930_s25 = smov %s937_s27 }
 0x107   : >> { %s412_s20 = scalar_lea.vmem %s861_s14, %s561_s28 [#allocation2]   ;;  %s413_s15 = scalar_lea.vmem %s874_s22, %s561_s28  }
 0x10c PF: > { %s905_s29 = sand.u32 3, %s935_s12   ;;  %s572_s30 = sshll.u32 %s880_s24, 5 }
 0x10d   : > { %s418_s4 = scalar_lea.vmem %s861_s14, %s572_s30 [#allocation2]   ;;  %s420_s5 = scalar_lea.vmem %s874_s22, %s572_s30  }
 0x10e   : > { %p566_p13 = scmp.le.s32.totalorder %s905_s29, 0 }
 0x10f   : > { %s771_s6 = smov (!%p566_p13), %s420_s5   ;;  %s775_s7 = smov (!%p566_p13), %s418_s4  }
 0x110   : > { %511 = sbr.rel (%p566_p13) target bundleno = 289 (0x121), region = 127  ;;  %s779_s8 = smov (!%p566_p13), 0  }
 0x111   : > { %s783_s9 = smov (!%p566_p13), 0  }
 0x117 LB: >> { %v430_v23 = vld [vmem:[%s777_s7] sm:$0xff]  ;;  %s432_s10 = sadd.s32 1, %s781_s8  ;;  %s424_s9 = sadd.s32 1, %s785_s9   ;;  %s785_s9 = sphi %s783_s9, %s424_s9   ;;  %s781_s8 = sphi %s779_s8, %s780_s8   ;;  %s777_s7 = sphi %s775_s7, %s437_s7   ;;  %s773_s6 = sphi %s771_s6, %s438_s6  }
 0x118   : >> { %431 = vst [vmem:[%s773_s6] sm:$0xff] %v430_v23  ;;  %p433_p0 = scmp.ge.s32.totalorder %s432_s10, %s905_s29  ;;  %p423_p1 = scmp.ge.s32.totalorder %s424_s9, %s905_s29 }
 0x11a   : >> { %s939_s10 = smov (%p433_p0, %s432_s10), 0  ;;  %426 = sbr.rel (!%p423_p1) target bundleno = 279 (0x117), region = 133 }
 0x11b   : >> { %s567_s11 = sshll.u32 %s939_s10, 3  ;;  %s780_s8 = smov %s939_s10  }
 0x11c   : >> { %s437_s7 = scalar_lea.vmem %s418_s4, %s567_s11 [#allocation2]   ;;  %s438_s6 = scalar_lea.vmem %s420_s5, %s567_s11  }
 0x121 PF: > { %p10_p2 = scmp.ge.s32.totalorder %s823_s16, 4   ;;  %s931_s12 = smov %s749_s13 }
 0x122   : > { %s932_s13 = smov %s831_s19  ;;  %s933_s14 = smov %s823_s16 }
 0x123   :  { %12 = sbr.rel (!%p10_p2) target bundleno = 2 (0x2), region = 144 }

</bundles_post_ra>
